<compile_context>
chip_gen: v5e
topology: v5e:2x2
jax: 0.10.0
libtpu: 0.0.40
codegen_flags: <defaults>
</compile_context>

<pallas_src>
import functools
import math

import jax
import jax.numpy as jnp
from jax.experimental import pallas as pl
from jax.experimental.pallas import tpu as pltpu


_LANES = 128
_MIB = 1024 * 1024
_MIN_GRID_STEPS = 8  # keep the DMA pipeline busy; feed both TensorCores on v7x


def _ceil_div(a: int, b: int) -> int:
    return -(-a // b)


def _round_up(a: int, m: int) -> int:
    return _ceil_div(a, m) * m


def _vmem_capacity_bytes() -> int:
    """Physical VMEM of the current generation (fallback: 128 MiB, v5e/v6e)."""
    try:
        cap = getattr(pltpu.get_tpu_info(), "vmem_capacity_bytes", None)
        if cap:
            return int(cap)
    except Exception:
        pass
    return 128 * _MIB


def _block_budget_bytes(vmem_cap: int) -> int:
    # ~6 MiB blocks on 64-MiB-VMEM parts (v7x), ~8 MiB on 128-MiB parts (v5e/v6e).
    return 6 * _MIB if vmem_cap <= 64 * _MIB else 8 * _MIB


def _sublanes_for(dtype) -> int:
    # Native sublane tiling: 8 for f32, 16 for bf16, 32 for int8/fp8.
    return max(8, 32 // jnp.dtype(dtype).itemsize)


def _choose_tile_rows(rows: int, row_bytes: int, sublane: int,
                      block_budget: int) -> int:
    """Row-tile choice: VMEM-budget-bound, sublane-aligned, pipeline-friendly grid."""
    rows_pad = _round_up(rows, sublane)
    budget_rows = max(sublane, (block_budget // max(row_bytes, 1)) // sublane * sublane)

    if rows_pad <= budget_rows:
        # Whole slab fits in one block.
        if rows_pad <= _MIN_GRID_STEPS * sublane:
            return rows  # tiny input: one full-extent block; extra steps = pure overhead
        # Split anyway so DMA/compute pipeline and (v7x) both cores get work.
        tr = _round_up(_ceil_div(rows, _MIN_GRID_STEPS), sublane)
        return min(tr, rows)

    tr = budget_rows
    # Prefer a tile that divides the padded row count (no masked partial last tile),
    # searching only a few sublane steps below the budget-optimal size.
    for cand in range(tr, max(sublane, tr - 8 * sublane) - 1, -sublane):
        if rows_pad % cand == 0:
            tr = cand
            break
    # Prefer an even number of grid steps (2-TC sharding on v7x).
    steps = _ceil_div(rows, tr)
    if steps > 1 and steps % 2 == 1:
        tr_even = _round_up(_ceil_div(rows, steps + 1), sublane)
        if sublane <= tr_even <= tr:
            tr = tr_even
    return min(tr, rows)


def _cmvn_kernel_var(x_ref, mean_ref, istd_ref, o_ref):
    # x_ref: (TILE_R, W); mean/istd: (1, W) f32 broadcast over rows.
    x = x_ref[...].astype(jnp.float32)
    o_ref[...] = ((x - mean_ref[...]) * istd_ref[...]).astype(o_ref.dtype)


def _cmvn_kernel_novar(x_ref, mean_ref, o_ref):
    x = x_ref[...].astype(jnp.float32)
    o_ref[...] = (x - mean_ref[...]).astype(o_ref.dtype)


def global_cmvn(x: jax.Array, mean: jax.Array, istd: jax.Array,
                norm_var: bool = True, donate_input: bool = False) -> jax.Array:
    """Pallas implementation of GlobalCMVN.forward.

    Args:
      x:    (batch, max_len, feat_dim)
      mean: (feat_dim,)
      istd: (feat_dim,)  inverse std (1.0 / std)
      norm_var:     multiply by istd after subtracting mean.
      donate_input: alias x's buffer as the output (only if caller no longer needs x).
    Returns:
      normalized x, same shape/dtype as x.
    """
    assert mean.shape == istd.shape == (x.shape[-1],)
    b, t, d = x.shape
    n = b * t
    itemsize = jnp.dtype(x.dtype).itemsize
    sublane = _sublanes_for(x.dtype)

    vmem_cap = _vmem_capacity_bytes()
    block_budget = _block_budget_bytes(vmem_cap)

    mean_f32 = mean.astype(jnp.float32)
    istd_f32 = istd.astype(jnp.float32)

    # Lane-dense packing: W = lcm(d, 128) lanes per row when the row count divides
    # and at least one sublane-group of packed rows fits the block budget.
    rep = _LANES // math.gcd(d, _LANES)
    lane_dense = (n % rep == 0) and (d * rep * itemsize * sublane <= block_budget)
    if lane_dense:
        rows, width = n // rep, d * rep
        x2 = x.reshape(rows, width)                          # free row-major reshape
        mean2 = jnp.tile(mean_f32, rep).reshape(1, width)
        istd2 = jnp.tile(istd_f32, rep).reshape(1, width)
    else:
        # Narrow fallback (feat_dim stays the full-extent last dim): correct and
        # HBM-traffic-optimal; only the vreg->VMEM stores are lane-masked.
        rows, width = n, d
        x2 = x.reshape(rows, width)
        mean2 = mean_f32.reshape(1, width)
        istd2 = istd_f32.reshape(1, width)

    row_bytes = width * itemsize
    tile_r = _choose_tile_rows(rows, row_bytes, sublane, block_budget)
    grid = (_ceil_div(rows, tile_r),)

    # VMEM needed: double-buffered in + out blocks plus (tiny, resident) f32 stat rows.
    data_block = tile_r * width * itemsize
    stats_bytes = (2 if norm_var else 1) * 2 * width * 4
    need = 2 * (data_block + data_block) + stats_bytes
    vmem_limit = max(need + 8 * _MIB, 32 * _MIB)
    vmem_limit = min(vmem_limit, vmem_cap - 16 * _MIB)
    vmem_limit = max(vmem_limit, need + 2 * _MIB)

    x_spec = pl.BlockSpec((tile_r, width), lambda i: (i, 0))
    stat_spec = pl.BlockSpec((1, width), lambda i: (0, 0))

    if norm_var:
        kernel = _cmvn_kernel_var
        in_specs = [x_spec, stat_spec, stat_spec]
        operands = (x2, mean2, istd2)
    else:
        kernel = _cmvn_kernel_novar
        in_specs = [x_spec, stat_spec]
        operands = (x2, mean2)

    out2 = pl.pallas_call(
        kernel,
        out_shape=jax.ShapeDtypeStruct((rows, width), x.dtype),
        grid_spec=pltpu.PrefetchScalarGridSpec(
            num_scalar_prefetch=0,
            grid=grid,
            in_specs=in_specs,
            out_specs=pl.BlockSpec((tile_r, width), lambda i: (i, 0)),
        ),
        compiler_params=pltpu.CompilerParams(
            dimension_semantics=("parallel",),
            vmem_limit_bytes=int(vmem_limit)),
        input_output_aliases=({0: 0} if donate_input else {}),
    )(*operands)

    return out2.reshape(b, t, d)


if __name__ == "__main__":
    key = jax.random.PRNGKey(0)
    k1, k2, k3, k4, k5 = jax.random.split(key, 5)

    # Primary case (matches the module's (B, T, D) convention).
    batch, max_len, feat_dim = 2, 8, 32
    x = jax.random.normal(k1, (batch, max_len, feat_dim), dtype=jnp.float32)
    mean = jax.random.normal(k2, (feat_dim,), dtype=jnp.float32)
    std = jax.random.uniform(k3, (feat_dim,), dtype=jnp.float32,
                             minval=0.5, maxval=2.0)
    istd = 1.0 / std

    out = jax.block_until_ready(global_cmvn(x, mean, istd, norm_var=True))
    ref = (x - mean[None, None, :]) * istd[None, None, :]
    assert out.shape == x.shape and out.dtype == x.dtype
    assert jnp.allclose(out, ref, atol=1e-6, rtol=1e-6)

    # norm_var=False path (istd not passed to the kernel at all).
    out2 = jax.block_until_ready(global_cmvn(x, mean, istd, norm_var=False))
    assert jnp.allclose(out2, x - mean[None, None, :], atol=1e-6, rtol=1e-6)

    # Narrow fallback path: feat_dim=80, row count not divisible by rep=8.
    xb = jax.random.normal(k4, (3, 7, 80), dtype=jnp.float32)
    mb = jnp.linspace(-1.0, 1.0, 80, dtype=jnp.float32)
    ib = jnp.linspace(0.5, 2.0, 80, dtype=jnp.float32)
    outb = jax.block_until_ready(global_cmvn(xb, mb, ib, norm_var=True))
    refb = (xb - mb[None, None, :]) * ib[None, None, :]
    assert jnp.allclose(outb, refb, atol=1e-6, rtol=1e-6)

    # Multi-step lane-dense path (speech-like D=80, rows divisible by rep=8):
    # exercises the >1-step grid, sublane-aligned tiles and partial-free packing.
    xc = jax.random.normal(k5, (4, 256, 80), dtype=jnp.float32)
    outc = jax.block_until_ready(global_cmvn(xc, mb, ib, norm_var=True))
    refc = (xc - mb[None, None, :]) * ib[None, None, :]
    assert jnp.allclose(outc, refc, atol=1e-6, rtol=1e-6)

    # bf16 input: stats stay f32 in-kernel, result cast to bf16 (16-sublane tiles).
    xh = x.astype(jnp.bfloat16)
    outh = jax.block_until_ready(global_cmvn(xh, mean, istd, norm_var=True))
    refh = ((xh.astype(jnp.float32) - mean[None, None, :])
            * istd[None, None, :]).astype(jnp.bfloat16)
    assert outh.dtype == jnp.bfloat16
    assert jnp.allclose(outh.astype(jnp.float32), refh.astype(jnp.float32),
                        atol=1e-2, rtol=1e-2)

    # Donated-input path (input_output_aliases={0: 0}) under jit.
    f_donate = jax.jit(functools.partial(global_cmvn, norm_var=True,
                                         donate_input=True))
    outd = jax.block_until_ready(f_donate(xc, mb, ib))
    assert jnp.allclose(outd, refc, atol=1e-6, rtol=1e-6)

    print("KERNEL_OK")
</pallas_src>

<mosaic_0001>
module attributes {stable_mosaic.version = 11 : i64} {
  func.func @_cmvn_kernel_var(%arg0: i32, %arg1: memref<4x128xf32, #tpu.memory_space<vmem>>, %arg2: memref<1x128xf32, #tpu.memory_space<vmem>>, %arg3: memref<1x128xf32, #tpu.memory_space<vmem>>, %arg4: memref<4x128xf32, #tpu.memory_space<vmem>>) attributes {dimension_semantics = [#tpu.dimension_semantics<parallel>], iteration_bounds = array<i64: 1>, scalar_prefetch = 0 : i64, scratch_operands = 0 : i64, tpu.core_type = #tpu.core_type<tc>, window_params = [{transform_indices = @transform_0, window_bounds = array<i64: 4, 128>}, {pipeline_mode = #tpu.pipeline_mode<synchronous>, transform_indices = @transform_1, window_bounds = array<i64: 1, 128>}, {pipeline_mode = #tpu.pipeline_mode<synchronous>, transform_indices = @transform_2, window_bounds = array<i64: 1, 128>}, {transform_indices = @transform_3, window_bounds = array<i64: 4, 128>}]} {
    %c0 = arith.constant 0 : index
    %c0_0 = arith.constant 0 : index
    %0 = vector.load %arg1[%c0, %c0_0] : memref<4x128xf32, #tpu.memory_space<vmem>>, vector<4x128xf32>
    %c0_1 = arith.constant 0 : index
    %c0_2 = arith.constant 0 : index
    %1 = vector.load %arg2[%c0_1, %c0_2] : memref<1x128xf32, #tpu.memory_space<vmem>>, vector<1x128xf32>
    %2 = vector.broadcast %1 : vector<1x128xf32> to vector<4x128xf32>
    %3 = arith.subf %0, %2 : vector<4x128xf32>
    %c0_3 = arith.constant 0 : index
    %c0_4 = arith.constant 0 : index
    %4 = vector.load %arg3[%c0_3, %c0_4] : memref<1x128xf32, #tpu.memory_space<vmem>>, vector<1x128xf32>
    %5 = vector.broadcast %4 : vector<1x128xf32> to vector<4x128xf32>
    %6 = arith.mulf %3, %5 : vector<4x128xf32>
    %c0_5 = arith.constant 0 : index
    %c0_6 = arith.constant 0 : index
    %7 = vector.load %arg4[%c0_5, %c0_6] : memref<4x128xf32, #tpu.memory_space<vmem>>, vector<4x128xf32>
    tpu.vector_store %arg4[%c0_5, %c0_6], %6 {strides = array<i32>} : memref<4x128xf32, #tpu.memory_space<vmem>>, vector<4x128xf32>,
    return
  }
  func.func @transform_0(%arg0: i32) -> (i32, i32) {
    %c0_i32 = arith.constant 0 : i32
    %c0_i32_0 = arith.constant 0 : i32
    return %arg0, %c0_i32 : i32, i32
  }
  func.func @transform_1(%arg0: i32) -> (i32, i32) {
    %c0_i32 = arith.constant 0 : i32
    %c0_i32_0 = arith.constant 0 : i32
    %c0_i32_1 = arith.constant 0 : i32
    return %c0_i32, %c0_i32_0 : i32, i32
  }
  func.func @transform_2(%arg0: i32) -> (i32, i32) {
    %c0_i32 = arith.constant 0 : i32
    %c0_i32_0 = arith.constant 0 : i32
    %c0_i32_1 = arith.constant 0 : i32
    return %c0_i32, %c0_i32_0 : i32, i32
  }
  func.func @transform_3(%arg0: i32) -> (i32, i32) {
    %c0_i32 = arith.constant 0 : i32
    %c0_i32_0 = arith.constant 0 : i32
    return %arg0, %c0_i32 : i32, i32
  }
}

</mosaic_0001>

<bundles_post_ra>
// kernel: tpu_custom_call.1
= control target key start
LH: loop header
LB: loop body
LE: loop exit
PB: predicated region body
PF: predicated region fallthrough
CT: control target
= control target key end

     0   :  { %8 = vsyncpa [#allocation3], 0  ;;  %s191_s0 = inlined_call_operand.hbm [shape: f32[4,128], index: 0, kind: input, shape index: {}]   ;;  %s192_s1 = inlined_call_operand.hbm [shape: f32[1,128], index: 1, kind: input, shape index: {}]   ;;  %s193_s2 = inlined_call_operand.vmem [shape: f32[1,128], index: 2, kind: input, shape index: {}]   ;;  %s194_s3 = inlined_call_operand.hbm [shape: f32[4,128], index: 3, kind: output, shape index: {}]  }
   0x1   :  { %9 = vsyncpa [#allocation6], 0 }
   0x2   :  { %10 = vsyncpa [#allocation4], 0  ;;  %s16_s14 = sshll.u32 %s191_s0, 4  ;;  %s156_s15 = smov [#allocation2]   ;;  %s17_s14 = int_to_ptr.hbm [resolvable:$true] %s16_s14 }
   0x3   :  { %s18_s16 = sshll.u32 %s156_s15, 4  ;;  %s27_s19 = sshll.u32 %s192_s1, 4  ;;  %s19_s16 = int_to_ptr.vmem [resolvable:$true] %s18_s16  ;;  %s28_s19 = int_to_ptr.hbm [resolvable:$true] %s27_s19 }
   0x4   :  { %21 = dma.hbm_to_vmem [thread:$0]  %s17_s14, 64, %s19_s16, [#allocation3]  }
   0x5   :  { %s157_s20 = smov [#allocation5]  }
   0x6   :  { %s29_s21 = sshll.u32 %s157_s20, 4  ;;  %s30_s21 = int_to_ptr.vmem [resolvable:$true] %s29_s21 }
   0x7   :  { %32 = dma.hbm_to_vmem [thread:$0]  %s28_s19, 16, %s30_s21, [#allocation6]  }
   0x8   :  { %150 = dma.done.wait [#allocation3], 64  }
   0x9   :  { %151 = vsyncadd [#allocation3], 4294967232 }
   0xa   :  { %152 = dma.done.wait [#allocation6], 16  }
   0xb   :  { %153 = vsyncadd [#allocation6], 4294967280  ;;  %v43_v0 = vld [vmem:[#allocation2] sm:$0xf]  ;;  %v76_v1 = vld [vmem:[#allocation5] ss:$0 sm:$0xff] }
   0xc   :  { %v77_v2 = vld [vmem:[%s193_s2] ss:$0 sm:$0xff]  ;;  %s158_s23 = smov [#allocation7]   ;;  %s62_s26 = sshll.u32 %s194_s3, 4  ;;  %v48_v3 = vsub.f32 %v43_v0, %v76_v1  ;;  %s63_s26 = int_to_ptr.hbm [resolvable:$true] %s62_s26 }
   0xd   :  { %s60_s24 = sshll.u32 %s158_s23, 4  ;;  %s61_s24 = int_to_ptr.vmem [resolvable:$true] %s60_s24 }
   0xe   :  { %v53_v4 = vmul.f32 %v77_v2, %v48_v3 }
  0x10   :  { %54 = vst [vmem:[#allocation7] sm:$0xf] %v53_v4 }
  0x11   :  { %65 = dma.vmem_to_hbm [thread:$0]  %s61_s24, 64, %s63_s26, [#allocation4]  }
  0x12   :  { %154 = dma.done.wait [#allocation4], 64  }
  0x13   :  { %155 = vsyncadd [#allocation4], 4294967232 }
  0x14   :  { %70 = vsyncpa [#allocation3], 1 }
  0x15   :  { %71 = vsyncpa [#allocation6], 1 }
  0x16   :  { %72 = vsyncpa [#allocation4], 1 }

</bundles_post_ra>
